<compile_context>
chip_gen: v6e
topology: v6e:2x2x1
jax: 0.10.0
libtpu: 0.0.40
codegen_flags: <defaults>
</compile_context>

<pallas_src>
import functools

import jax
import jax.numpy as jnp
from jax.experimental import pallas as pl
from jax.experimental.pallas import tpu as pltpu


# ----------------------------- kernels --------------------------------------

def _abs_masked_kernel(co_ref, cg_ref, v_ref, o_ref, *, acc_dtype):
    """o = |co - gt| * valid  (pure elementwise streaming)."""
    co = co_ref[...].astype(acc_dtype)
    cg = cg_ref[...].astype(acc_dtype)
    v = v_ref[...].astype(acc_dtype)
    o_ref[...] = (jnp.abs(co - cg) * v).astype(o_ref.dtype)


def _abs_masked_gated_kernel(co_ref, cg_ref, v_ref, g_ref, o_ref, *, acc_dtype):
    """o = |co - gt| * valid * gate  (gate precomputed in the wrapper)."""
    co = co_ref[...].astype(acc_dtype)
    cg = cg_ref[...].astype(acc_dtype)
    v = v_ref[...].astype(acc_dtype)
    g = g_ref[...].astype(acc_dtype)
    o_ref[...] = (jnp.abs(co - cg) * v * g).astype(o_ref.dtype)


# ----------------------------- tiling helpers --------------------------------

_SUBLANE_PACK = 32                 # lcm of 8 (f32) / 16 (bf16) / 32 (i8) row packing
_PIPELINE_VMEM_BUDGET = 24 << 20   # total for all double-buffered streams
_VMEM_LIMIT_BYTES = 32 << 20       # explicit scoped-VMEM limit (safe on v5e/v6e/v7x)


def _round_up(x, m):
    return (x + m - 1) // m * m


def _flat_layout(n):
    """Pick (padded_len, lane_width). Prefer a lane width that divides n so the
    flatten is completely free; otherwise pad up to a multiple of 1024 (8x128).
    """
    for lane in (1024, 512, 256, 128):
        if n % lane == 0:
            return n, lane
    return _round_up(n, 1024), 1024


def _pick_rows_per_block(num_rows, lane, itemsize, n_streams):
    """Rows per grid step.

    Per-stream-per-buffer budget ~2.4-3 MiB: big enough to amortize the
    ~0.35us per-step overhead (matters most on v7x's 3.2 TB/s HBM), small
    enough that n_streams x 2 pipeline buffers fit the 32 MiB vmem limit we
    request (well inside v5e/v6e 128 MiB and v7x 64 MiB physical VMEM).
    """
    row_bytes = lane * itemsize
    per_stream = max(row_bytes, _PIPELINE_VMEM_BUDGET // (2 * n_streams))
    if num_rows * row_bytes <= per_stream:
        # Whole array in one block: never force a split (v5e/v6e have a single
        # TensorCore, so extra grid steps are pure per-step overhead).
        return num_rows
    rows = max(_SUBLANE_PACK,
               (per_stream // row_bytes) // _SUBLANE_PACK * _SUBLANE_PACK)
    # Prefer an even number of grid steps so the two v7x TensorCores get a
    # balanced share of this "parallel" axis.
    steps = -(-num_rows // rows)
    if steps > 1 and steps % 2 == 1:
        rows = _round_up(-(-num_rows // (steps + 1)), _SUBLANE_PACK)
    return min(rows, num_rows)


# ----------------------------- wrapper ---------------------------------------

def coord_loss(coord_out, coord_gt, valid, is_3D=None):
    """Pallas implementation of CoordLoss.forward.

    coord_out, coord_gt, valid: (B, J, C); is_3D: optional (B,) gate.
    Returns (B, J, C) in the promoted dtype (matches torch type promotion).
    """
    B, J, C = coord_out.shape
    n = B * J * C

    # Torch promotes |co - gt| * valid; the is_3D branch multiplies by .float().
    out_dtype = jnp.result_type(coord_out.dtype, coord_gt.dtype, valid.dtype)
    if is_3D is not None:
        out_dtype = jnp.result_type(out_dtype, jnp.float32)

    # NOTE: the flatten relies on the standard contiguous row-major (B, J, C)
    # layout of JAX arrays; channel c of the flat index is (idx % C).
    streams = [coord_out.reshape(n), coord_gt.reshape(n), valid.reshape(n)]
    if is_3D is not None:
        chan = jnp.arange(C, dtype=jnp.int32)[None, None, :]          # (1,1,C)
        gate = jnp.where(chan < 2,
                         jnp.ones((), out_dtype),
                         is_3D.astype(out_dtype)[:, None, None])       # (B,1,C)
        gate = jnp.broadcast_to(gate, (B, J, C)).reshape(n)
        streams.append(gate)

    padded_n, lane = _flat_layout(n)
    pad = padded_n - n
    if pad:
        # Pad is only needed when 128 does not divide B*J*C; the padded tail is
        # sliced off below.  In a fused loss graph this pad fuses upstream.
        streams = [jnp.pad(s, (0, pad)) for s in streams]
    rows = padded_n // lane
    streams2d = [s.reshape(rows, lane) for s in streams]

    itemsize = max([jnp.dtype(s.dtype).itemsize for s in streams2d]
                   + [jnp.dtype(out_dtype).itemsize])
    n_streams = len(streams2d) + 1
    tr = _pick_rows_per_block(rows, lane, itemsize, n_streams)
    grid = (pl.cdiv(rows, tr),)
    blk = pl.BlockSpec((tr, lane), lambda i: (i, 0))

    bytes_accessed = (sum(int(s.size) * jnp.dtype(s.dtype).itemsize
                          for s in streams2d)
                      + padded_n * jnp.dtype(out_dtype).itemsize)
    flops = (4 if is_3D is not None else 3) * padded_n   # sub + abs + mul(s)
    cost = pl.CostEstimate(flops=flops, transcendentals=0,
                           bytes_accessed=bytes_accessed)

    if is_3D is None:
        kernel = functools.partial(_abs_masked_kernel, acc_dtype=out_dtype)
    else:
        kernel = functools.partial(_abs_masked_gated_kernel, acc_dtype=out_dtype)

    out2d = pl.pallas_call(
        kernel,
        out_shape=jax.ShapeDtypeStruct((rows, lane), out_dtype),
        grid=grid,
        in_specs=[blk] * len(streams2d),
        out_specs=blk,
        compiler_params=pltpu.CompilerParams(
            dimension_semantics=("parallel",),
            vmem_limit_bytes=_VMEM_LIMIT_BYTES),
        cost_estimate=cost,
    )(*streams2d)

    out_flat = out2d.reshape(padded_n)
    if pad:
        out_flat = out_flat[:n]
    return out_flat.reshape(B, J, C)


# ----------------------------- reference & demo ------------------------------

def _reference(coord_out, coord_gt, valid, is_3D=None):
    loss = jnp.abs(coord_out - coord_gt) * valid
    if is_3D is not None:
        loss_z = loss[:, :, 2:] * is_3D[:, None, None].astype(jnp.float32)
        loss = jnp.concatenate((loss[:, :, :2], loss_z), axis=2)
    return loss


def _make_inputs(key, B, J, C):
    k1, k2, k3, k4 = jax.random.split(key, 4)
    coord_out = jax.random.normal(k1, (B, J, C), dtype=jnp.float32)
    coord_gt = jax.random.normal(k2, (B, J, C), dtype=jnp.float32)
    valid = (jax.random.uniform(k3, (B, J, C)) > 0.2).astype(jnp.float32)
    is_3D = (jax.random.uniform(k4, (B,)) > 0.5).astype(jnp.float32)
    return coord_out, coord_gt, valid, is_3D


if __name__ == "__main__":
    key = jax.random.PRNGKey(0)

    # Small demo shapes.
    co, gt, va, is3d = _make_inputs(key, B=2, J=8, C=3)

    out = jax.block_until_ready(coord_loss(co, gt, va, is3d))
    ref = _reference(co, gt, va, is3d)
    assert out.shape == ref.shape
    assert jnp.allclose(out, ref, atol=1e-6), "mismatch with is_3D"

    out2 = jax.block_until_ready(coord_loss(co, gt, va, None))
    ref2 = _reference(co, gt, va, None)
    assert jnp.allclose(out2, ref2, atol=1e-6), "mismatch without is_3D"

    # Typical hand shape (J=21, C=3) to exercise the padded lane-dense path.
    co3, gt3, va3, is3d3 = _make_inputs(jax.random.PRNGKey(1), B=4, J=21, C=3)
    out3 = jax.block_until_ready(coord_loss(co3, gt3, va3, is3d3))
    ref3 = _reference(co3, gt3, va3, is3d3)
    assert jnp.allclose(out3, ref3, atol=1e-6), "mismatch on hand shape"

    print("KERNEL_OK")
</pallas_src>

<mosaic_0001>
module attributes {stable_mosaic.version = 11 : i64} {
  func.func @_abs_masked_gated_kernel(%arg0: i32, %arg1: memref<1x1024xf32, #tpu.memory_space<vmem>>, %arg2: memref<1x1024xf32, #tpu.memory_space<vmem>>, %arg3: memref<1x1024xf32, #tpu.memory_space<vmem>>, %arg4: memref<1x1024xf32, #tpu.memory_space<vmem>>, %arg5: memref<1x1024xf32, #tpu.memory_space<vmem>>) attributes {dimension_semantics = [#tpu.dimension_semantics<parallel>], iteration_bounds = array<i64: 1>, scalar_prefetch = 0 : i64, scratch_operands = 0 : i64, tpu.core_type = #tpu.core_type<tc>, window_params = [{transform_indices = @transform_0, window_bounds = array<i64: 1, 1024>}, {transform_indices = @transform_1, window_bounds = array<i64: 1, 1024>}, {transform_indices = @transform_2, window_bounds = array<i64: 1, 1024>}, {transform_indices = @transform_3, window_bounds = array<i64: 1, 1024>}, {transform_indices = @transform_4, window_bounds = array<i64: 1, 1024>}]} {
    %c0 = arith.constant 0 : index
    %c0_0 = arith.constant 0 : index
    %0 = vector.load %arg1[%c0, %c0_0] : memref<1x1024xf32, #tpu.memory_space<vmem>>, vector<1x1024xf32>
    %c0_1 = arith.constant 0 : index
    %c0_2 = arith.constant 0 : index
    %1 = vector.load %arg2[%c0_1, %c0_2] : memref<1x1024xf32, #tpu.memory_space<vmem>>, vector<1x1024xf32>
    %c0_3 = arith.constant 0 : index
    %c0_4 = arith.constant 0 : index
    %2 = vector.load %arg3[%c0_3, %c0_4] : memref<1x1024xf32, #tpu.memory_space<vmem>>, vector<1x1024xf32>
    %c0_5 = arith.constant 0 : index
    %c0_6 = arith.constant 0 : index
    %3 = vector.load %arg4[%c0_5, %c0_6] : memref<1x1024xf32, #tpu.memory_space<vmem>>, vector<1x1024xf32>
    %4 = arith.subf %0, %1 : vector<1x1024xf32>
    %5 = math.absf %4 : vector<1x1024xf32>
    %6 = arith.mulf %5, %2 : vector<1x1024xf32>
    %7 = arith.mulf %6, %3 : vector<1x1024xf32>
    %c0_7 = arith.constant 0 : index
    %c0_8 = arith.constant 0 : index
    %8 = vector.load %arg5[%c0_7, %c0_8] : memref<1x1024xf32, #tpu.memory_space<vmem>>, vector<1x1024xf32>
    tpu.vector_store %arg5[%c0_7, %c0_8], %7 {strides = array<i32>} : memref<1x1024xf32, #tpu.memory_space<vmem>>, vector<1x1024xf32>,
    return
  }
  func.func @transform_0(%arg0: i32) -> (i32, i32) {
    %c0_i32 = arith.constant 0 : i32
    %c0_i32_0 = arith.constant 0 : i32
    return %arg0, %c0_i32 : i32, i32
  }
  func.func @transform_1(%arg0: i32) -> (i32, i32) {
    %c0_i32 = arith.constant 0 : i32
    %c0_i32_0 = arith.constant 0 : i32
    return %arg0, %c0_i32 : i32, i32
  }
  func.func @transform_2(%arg0: i32) -> (i32, i32) {
    %c0_i32 = arith.constant 0 : i32
    %c0_i32_0 = arith.constant 0 : i32
    return %arg0, %c0_i32 : i32, i32
  }
  func.func @transform_3(%arg0: i32) -> (i32, i32) {
    %c0_i32 = arith.constant 0 : i32
    %c0_i32_0 = arith.constant 0 : i32
    return %arg0, %c0_i32 : i32, i32
  }
  func.func @transform_4(%arg0: i32) -> (i32, i32) {
    %c0_i32 = arith.constant 0 : i32
    %c0_i32_0 = arith.constant 0 : i32
    return %arg0, %c0_i32 : i32, i32
  }
}

</mosaic_0001>

<bundles_post_ra>
// kernel: tpu_custom_call.1
= control target key start
LH: loop header
LB: loop body
LE: loop exit
PB: predicated region body
PF: predicated region fallthrough
CT: control target
= control target key end

     0   :  { %9 = vsyncpa [#allocation3], 0  ;;  %s249_s0 = inlined_call_operand.hbm [shape: f32[1,1024], index: 0, kind: input, shape index: {}]   ;;  %s250_s1 = inlined_call_operand.hbm [shape: f32[1,1024], index: 1, kind: input, shape index: {}]   ;;  %s251_s2 = inlined_call_operand.hbm [shape: f32[1,1024], index: 2, kind: input, shape index: {}]   ;;  %s252_s3 = inlined_call_operand.hbm [shape: f32[1,1024], index: 3, kind: input, shape index: {}]   ;;  %s253_s4 = inlined_call_operand.hbm [shape: f32[1,1024], index: 4, kind: output, shape index: {}]  }
   0x1   :  { %10 = vsyncpa [#allocation6], 0 }
   0x2   :  { %11 = vsyncpa [#allocation9], 0 }
   0x3   :  { %12 = vsyncpa [#allocation4], 0  ;;  %s204_s15 = smov [#allocation5]   ;;  %s205_s17 = smov [#allocation2]  }
   0x4   :  { %s29_s16 = sshll.u32 %s204_s15, 4  ;;  %s19_s18 = sshll.u32 %s205_s17, 4  ;;  %s30_s16 = int_to_ptr.vmem [resolvable:$true] %s29_s16  ;;  %s20_s18 = int_to_ptr.vmem [resolvable:$true] %s19_s18 }
   0x5   :  { %s104_s19 = scalar_lea.vmem %s30_s16, 128  ;;  %p109_p1 = scmp.lt.s32.totalorder %s30_s16, %s30_s16 }
   0x6   :  { %p105_p0 = scmp.ne.s32.totalorder %s30_s16, %s104_s19  ;;  %p110_p2 = scmp.lt.s32.totalorder %s104_s19, %s104_s19 }
   0x8   :  { %p111_p3 = por %p110_p2, %p109_p1 }
   0xa   :  { %p112_p4 = pnand %p111_p3, %p105_p0 }
   0xc   :  { %115 = shalt.err (!%p112_p4)
}
   0xd   :  { %32 = dma.hbm_to_vmem [thread:$0]  %s250_s1, 128, %s30_s16, [#allocation6]  }
   0xe   :  { %s124_s22 = scalar_lea.vmem %s20_s18, 128  ;;  %p129_p6 = scmp.lt.s32.totalorder %s20_s18, %s20_s18 }
   0xf   :  { %p125_p5 = scmp.ne.s32.totalorder %s20_s18, %s124_s22  ;;  %p130_p7 = scmp.lt.s32.totalorder %s124_s22, %s124_s22 }
  0x11   :  { %p131_p8 = por %p130_p7, %p129_p6 }
  0x13   :  { %p132_p9 = pnand %p131_p8, %p125_p5 }
  0x15   :  { %135 = shalt.err (!%p132_p9)
}
  0x16   :  { %22 = dma.hbm_to_vmem [thread:$0]  %s249_s0, 128, %s20_s18, [#allocation3]  }
  0x17   :  { %s206_s25 = smov [#allocation7]   ;;  %s207_s27 = smov [#allocation8]  }
  0x18   :  { %s39_s26 = sshll.u32 %s206_s25, 4  ;;  %s49_s28 = sshll.u32 %s207_s27, 4  ;;  %s40_s26 = int_to_ptr.vmem [resolvable:$true] %s39_s26  ;;  %s50_s28 = int_to_ptr.vmem [resolvable:$true] %s49_s28 }
  0x19   :  { %s144_s29 = scalar_lea.vmem %s40_s26, 128  ;;  %p149_p11 = scmp.lt.s32.totalorder %s40_s26, %s40_s26 }
  0x1a   :  { %p145_p10 = scmp.ne.s32.totalorder %s40_s26, %s144_s29  ;;  %p150_p12 = scmp.lt.s32.totalorder %s144_s29, %s144_s29 }
  0x1c   :  { %p151_p13 = por %p150_p12, %p149_p11 }
  0x1e   :  { %p152_p0 = pnand %p151_p13, %p145_p10 }
  0x20   :  { %155 = shalt.err (!%p152_p0)
}
  0x21   :  { %42 = dma.hbm_to_vmem [thread:$0]  %s251_s2, 128, %s40_s26, [#allocation6]  }
  0x22   :  { %s164_s5 = scalar_lea.vmem %s50_s28, 128  ;;  %p169_p2 = scmp.lt.s32.totalorder %s50_s28, %s50_s28 }
  0x23   :  { %p165_p1 = scmp.ne.s32.totalorder %s50_s28, %s164_s5  ;;  %p170_p3 = scmp.lt.s32.totalorder %s164_s5, %s164_s5 }
  0x25   :  { %p171_p4 = por %p170_p3, %p169_p2 }
  0x27   :  { %p172_p5 = pnand %p171_p4, %p165_p1 }
  0x29   :  { %175 = shalt.err (!%p172_p5)
}
  0x2a   :  { %52 = dma.hbm_to_vmem [thread:$0]  %s252_s3, 128, %s50_s28, [#allocation9]  }
  0x2b   :  { %196 = dma.done.wait [#allocation3], 128  }
  0x2c   :  { %197 = vsyncadd [#allocation3], 4294967168 }
  0x2d   :  { %198 = dma.done.wait [#allocation6], 256  }
  0x2e   :  { %199 = vsyncadd [#allocation6], 4294967040 }
  0x2f   :  { %200 = dma.done.wait [#allocation9], 128  }
  0x30   :  { %201 = vsyncadd [#allocation9], 4294967168  ;;  %v65_v0 = vld [vmem:[#allocation2] sm:$0xff]  ;;  %v66_v1 = vld [vmem:[#allocation5] sm:$0xff]  ;;  %s208_s2 = smov [#allocation10]  }
  0x31   :  { %v69_v2 = vsub.f32 %v65_v0, %v66_v1  ;;  %v67_v3 = vld [vmem:[#allocation7] sm:$0xff]  ;;  %v68_v5 = vld [vmem:[#allocation8] sm:$0xff]  ;;  %s80_s7 = sshll.u32 %s208_s2, 4  ;;  %s81_s7 = int_to_ptr.vmem [resolvable:$true] %s80_s7 }
  0x32   :  { %s176_s8 = scalar_lea.vmem %s81_s7, 128  ;;  %p181_p7 = scmp.lt.s32.totalorder %s81_s7, %s81_s7 }
  0x33   :  { %v70_v4 = vand.u32 2147483647, %v69_v2  ;;  %p177_p6 = scmp.ne.s32.totalorder %s81_s7, %s176_s8  ;;  %p182_p8 = scmp.lt.s32.totalorder %s176_s8, %s176_s8 }
  0x35   :  { %v71_v6 = vmul.f32 %v70_v4, %v67_v3  ;;  %p183_p9 = por %p182_p8, %p181_p7 }
  0x37   :  { %v72_v7 = vmul.f32 %v71_v6, %v68_v5  ;;  %p184_p10 = pnand %p183_p9, %p177_p6 }
  0x39   :  { %73 = vst [vmem:[#allocation10] sm:$0xff] %v72_v7 }
  0x3a   :  { %187 = shalt.err (!%p184_p10)
}
  0x3b   :  { %83 = dma.vmem_to_hbm [thread:$0]  %s81_s7, 128, %s253_s4, [#allocation4]  }
  0x3c   :  { %202 = dma.done.wait [#allocation4], 128  }
  0x3d   :  { %203 = vsyncadd [#allocation4], 4294967168 }
  0x3e   :  { %87 = vsyncpa [#allocation3], 1 }
  0x3f   :  { %88 = vsyncpa [#allocation6], 1 }
  0x40   :  { %89 = vsyncpa [#allocation9], 1 }
  0x41   :  { %90 = vsyncpa [#allocation4], 1 }

</bundles_post_ra>
